<compile_context>
chip_gen: v7x
topology: tpu7x:2x2x1
jax: 0.10.0
libtpu: 0.0.40
codegen_flags: <defaults>
</compile_context>

<pallas_src>
import jax
import jax.numpy as jnp
import numpy as np
from jax.experimental import pallas as pl
from jax.experimental.pallas import tpu as pltpu


# --------------------------------------------------------------------------
# Kernel factory: double-buffered HBM->HBM DMA copy, chunked along axis 0.
# --------------------------------------------------------------------------
def _build_dma_copy_kernel(dim0: int, chunk_rows: int):
    n_full = dim0 // chunk_rows
    tail_rows = dim0 - n_full * chunk_rows

    def kernel(x_hbm, o_hbm, sem):
        # sem has shape (3,): slots 0/1 double-buffer the full chunks,
        # slot 2 is the (optional) ragged tail.
        def full_chunk(c, slot):
            start = c * chunk_rows
            return pltpu.make_async_copy(
                x_hbm.at[pl.ds(start, chunk_rows)],
                o_hbm.at[pl.ds(start, chunk_rows)],
                sem.at[slot],
            )

        # Statically-sized ragged tail: issue first so it overlaps the loop.
        if tail_rows:
            tail_start = n_full * chunk_rows
            tail = pltpu.make_async_copy(
                x_hbm.at[pl.ds(tail_start, tail_rows)],
                o_hbm.at[pl.ds(tail_start, tail_rows)],
                sem.at[2],
            )
            tail.start()

        if n_full:
            # Prime chunk 0, then keep two DMAs in flight.
            full_chunk(0, 0).start()

            @pl.loop(0, n_full)
            def _(c):
                slot = c & 1

                @pl.when(c + 1 < n_full)
                def _():
                    full_chunk(c + 1, 1 - slot).start()

                # Wait on the chunk issued for this slot (shape must match).
                full_chunk(c, slot).wait()

        if tail_rows:
            tail.wait()

    return kernel


# --------------------------------------------------------------------------
# Wrapper: materialized identity copy as a pure HBM->HBM DMA.
# --------------------------------------------------------------------------
def passthrough_copy(x: jax.Array, *, max_chunk_bytes: int = 8 << 20) -> jax.Array:
    """Materialized copy of `x` via direct HBM->HBM DMA (no VMEM staging)."""
    if x.size == 0:
        return jnp.copy(x)

    orig_shape = x.shape
    if x.ndim == 0:
        x = x.reshape(1)  # metadata-only reshape for the scalar edge case

    dim0 = int(x.shape[0])
    row_bytes = max(1, (int(x.size) // dim0) * jnp.dtype(x.dtype).itemsize)
    # Chunk size targets ~8 MiB per DMA so two in-flight copies keep the
    # DMA engines busy; VMEM is not involved, so no per-generation tuning
    # or scoped-VMEM limit is needed.
    chunk_rows = int(min(dim0, max(1, max_chunk_bytes // row_bytes)))

    out = pl.pallas_call(
        _build_dma_copy_kernel(dim0, chunk_rows),
        out_shape=jax.ShapeDtypeStruct(x.shape, x.dtype),
        in_specs=[pl.BlockSpec(memory_space=pl.ANY)],
        out_specs=pl.BlockSpec(memory_space=pl.ANY),
        scratch_shapes=[pltpu.SemaphoreType.DMA((3,))],
    )(x)
    return out.reshape(orig_shape)


# --------------------------------------------------------------------------
# Module wrapper.
# --------------------------------------------------------------------------
class BaseEncoderPallas:
    """JAX/Pallas analogue of vae.base.BaseEncoder.

    The PyTorch base class defines no weights; its forward() is abstract.
    # TODO(synk): forward() raises NotImplementedError in the reference —
    # concrete subclasses must override it.  Here the base-class path is a
    # zero-cost identity, and `passthrough_copy` provides a materialized
    # HBM->HBM DMA copy when a distinct buffer is required.
    """

    def __init__(self, config: dict):
        self.config = config
        self.device = config.get("device", "tpu")

    def forward(self, x: jax.Array) -> jax.Array:
        # Zero-cost identity: do not pay an HBM read+write for an op that
        # does nothing.
        return x

    def passthrough_copy(self, x: jax.Array, **kwargs) -> jax.Array:
        return passthrough_copy(x, **kwargs)

    def __call__(self, x: jax.Array) -> jax.Array:
        return self.forward(x)


if __name__ == "__main__":
    key = jax.random.PRNGKey(0)
    k0, k1 = jax.random.split(key)

    enc = BaseEncoderPallas({"device": "tpu"})

    # Small NCHW input consistent with a VAE encoder: batch=2, channels=4,
    # spatial 16x16.
    x = jax.random.normal(k0, (2, 4, 16, 16), dtype=jnp.float32)
    x_host = np.asarray(jax.device_get(x))

    # 1) Base-class hot path: zero-cost identity (no kernel, no HBM traffic).
    y_fast = enc(x)
    assert y_fast.shape == x.shape and y_fast.dtype == x.dtype

    # 2) Materialized copy, default chunking (single full-array DMA here).
    y = jax.block_until_ready(enc.passthrough_copy(x))
    assert y.shape == x.shape and y.dtype == x.dtype
    assert np.array_equal(np.asarray(jax.device_get(y)), x_host)

    # 3) Force multi-chunk double-buffered path (1-row chunks -> 2 full
    #    chunks, both semaphore slots exercised).
    y_mc = jax.block_until_ready(enc.passthrough_copy(x, max_chunk_bytes=1))
    assert np.array_equal(np.asarray(jax.device_get(y_mc)), x_host)

    # 4) Ragged-tail path with a packed dtype: dim0=5, 2-row chunks ->
    #    2 full chunks + a 1-row tail DMA.
    x3 = jax.random.normal(k1, (5, 4, 8, 8), dtype=jnp.bfloat16)
    row_bytes = 4 * 8 * 8 * 2
    y3 = jax.block_until_ready(
        enc.passthrough_copy(x3, max_chunk_bytes=2 * row_bytes))
    assert np.array_equal(np.asarray(jax.device_get(y3)),
                          np.asarray(jax.device_get(x3)))

    print("KERNEL_OK")
</pallas_src>

<mosaic_0001>
module attributes {stable_mosaic.version = 11 : i64} {
  func.func @kernel(%arg0: memref<2x4x16x16xf32, #tpu.memory_space<any>>, %arg1: memref<2x4x16x16xf32, #tpu.memory_space<any>>, %arg2: memref<3x!tpu.dma_semaphore, #tpu.memory_space<semaphore_mem>>) attributes {dimension_semantics = [], scalar_prefetch = 0 : i64, scratch_operands = 1 : i64, tpu.core_type = #tpu.core_type<tc>} {
    %c0_i32 = arith.constant 0 : i32
    %c0_i32_0 = arith.constant 0 : i32
    %c0_i32_1 = arith.constant 0 : i32
    %c0_i32_2 = arith.constant 0 : i32
    %c0_i32_3 = arith.constant 0 : i32
    %0 = tpu.memref_slice %arg0[%c0_i32_0, %c0_i32_1, %c0_i32_2, %c0_i32_3] : memref<2x4x16x16xf32, #tpu.memory_space<any>> -> memref<2x4x16x16xf32, #tpu.memory_space<any>>
    %c0_i32_4 = arith.constant 0 : i32
    %c0_i32_5 = arith.constant 0 : i32
    %c0_i32_6 = arith.constant 0 : i32
    %c0_i32_7 = arith.constant 0 : i32
    %1 = tpu.memref_slice %arg1[%c0_i32_4, %c0_i32_5, %c0_i32_6, %c0_i32_7] : memref<2x4x16x16xf32, #tpu.memory_space<any>> -> memref<2x4x16x16xf32, #tpu.memory_space<any>>
    %2 = tpu.memref_slice %arg2[%c0_i32] : memref<3x!tpu.dma_semaphore, #tpu.memory_space<semaphore_mem>> -> memref<1x!tpu.dma_semaphore, #tpu.memory_space<semaphore_mem>>
    %3 = tpu.memref_squeeze %2 : memref<1x!tpu.dma_semaphore, #tpu.memory_space<semaphore_mem>> -> memref<!tpu.dma_semaphore, #tpu.memory_space<semaphore_mem>>
    tpu.enqueue_dma source(%0 : memref<2x4x16x16xf32, #tpu.memory_space<any>>) target(%1 : memref<2x4x16x16xf32, #tpu.memory_space<any>>) target_semaphore(%3 : memref<!tpu.dma_semaphore, #tpu.memory_space<semaphore_mem>>)
    %c0_i32_8 = arith.constant 0 : i32
    %c1_i32 = arith.constant 1 : i32
    %4 = arith.muli %c0_i32_8, %c1_i32 : i32
    %c0_i32_9 = arith.constant 0 : i32
    %5 = arith.addi %c0_i32_9, %4 : i32
    %c1_i32_10 = arith.constant 1 : i32
    %6 = arith.andi %5, %c1_i32_10 : i32
    %c1_i32_11 = arith.constant 1 : i32
    %7 = arith.addi %5, %c1_i32_11 : i32
    %c1_i32_12 = arith.constant 1 : i32
    %8 = arith.cmpi slt, %7, %c1_i32_12 : i32
    %9 = arith.extui %8 : i1 to i32
    %c0_i32_13 = arith.constant 0 : i32
    %10 = arith.cmpi ne, %9, %c0_i32_13 : i32
    scf.if %10 {
      %c1_i32_21 = arith.constant 1 : i32
      %16 = arith.addi %5, %c1_i32_21 : i32
      %c1_i32_22 = arith.constant 1 : i32
      %17 = arith.subi %c1_i32_22, %6 : i32
      %c2_i32_23 = arith.constant 2 : i32
      %18 = arith.muli %16, %c2_i32_23 : i32
      %c0_i32_24 = arith.constant 0 : i32
      %c0_i32_25 = arith.constant 0 : i32
      %c0_i32_26 = arith.constant 0 : i32
      %19 = tpu.memref_slice %arg0[%18, %c0_i32_24, %c0_i32_25, %c0_i32_26] : memref<2x4x16x16xf32, #tpu.memory_space<any>> -> memref<2x4x16x16xf32, #tpu.memory_space<any>>
      %c0_i32_27 = arith.constant 0 : i32
      %c0_i32_28 = arith.constant 0 : i32
      %c0_i32_29 = arith.constant 0 : i32
      %20 = tpu.memref_slice %arg1[%18, %c0_i32_27, %c0_i32_28, %c0_i32_29] : memref<2x4x16x16xf32, #tpu.memory_space<any>> -> memref<2x4x16x16xf32, #tpu.memory_space<any>>
      %21 = tpu.memref_slice %arg2[%17] : memref<3x!tpu.dma_semaphore, #tpu.memory_space<semaphore_mem>> -> memref<1x!tpu.dma_semaphore, #tpu.memory_space<semaphore_mem>>
      %22 = tpu.memref_squeeze %21 : memref<1x!tpu.dma_semaphore, #tpu.memory_space<semaphore_mem>> -> memref<!tpu.dma_semaphore, #tpu.memory_space<semaphore_mem>>
      tpu.enqueue_dma source(%19 : memref<2x4x16x16xf32, #tpu.memory_space<any>>) target(%20 : memref<2x4x16x16xf32, #tpu.memory_space<any>>) target_semaphore(%22 : memref<!tpu.dma_semaphore, #tpu.memory_space<semaphore_mem>>)
    } else {
    }
    %c2_i32 = arith.constant 2 : i32
    %11 = arith.muli %5, %c2_i32 : i32
    %c0_i32_14 = arith.constant 0 : i32
    %c0_i32_15 = arith.constant 0 : i32
    %c0_i32_16 = arith.constant 0 : i32
    %12 = tpu.memref_slice %arg0[%11, %c0_i32_14, %c0_i32_15, %c0_i32_16] : memref<2x4x16x16xf32, #tpu.memory_space<any>> -> memref<2x4x16x16xf32, #tpu.memory_space<any>>
    %c0_i32_17 = arith.constant 0 : i32
    %c0_i32_18 = arith.constant 0 : i32
    %c0_i32_19 = arith.constant 0 : i32
    %13 = tpu.memref_slice %arg1[%11, %c0_i32_17, %c0_i32_18, %c0_i32_19] : memref<2x4x16x16xf32, #tpu.memory_space<any>> -> memref<2x4x16x16xf32, #tpu.memory_space<any>>
    %14 = tpu.memref_slice %arg2[%6] : memref<3x!tpu.dma_semaphore, #tpu.memory_space<semaphore_mem>> -> memref<1x!tpu.dma_semaphore, #tpu.memory_space<semaphore_mem>>
    %15 = tpu.memref_squeeze %14 : memref<1x!tpu.dma_semaphore, #tpu.memory_space<semaphore_mem>> -> memref<!tpu.dma_semaphore, #tpu.memory_space<semaphore_mem>>
    tpu.wait_dma2 semaphore(%15 : memref<!tpu.dma_semaphore, #tpu.memory_space<semaphore_mem>>) src(%12 : memref<2x4x16x16xf32, #tpu.memory_space<any>>) dst(%13 : memref<2x4x16x16xf32, #tpu.memory_space<any>>)
    %c1_i32_20 = arith.constant 1 : i32
    return
  }
}

</mosaic_0001>

<bundles_post_ra>
// kernel: tpu_custom_call.1
= control target key start
LH: loop header
LB: loop body
LE: loop exit
PB: predicated region body
PF: predicated region fallthrough
CT: control target
= control target key end

     0   :  { %s52_s6 = smov [#allocation2]   ;;  %s53_s7 = smov [#allocation3]   ;;  %s71_s0 = inlined_call_operand.hbm [shape: f32[2,4,16,16], index: 0, kind: input, shape index: {}]   ;;  %s72_s1 = inlined_call_operand.hbm [shape: f32[2,4,16,16], index: 1, kind: output, shape index: {}]  }
   0x1   :  { %s54_s8 = smov 0  }
   0x2   :  { %18 = dma.general %s71_s0, 2048, %s72_s1, %s52_s6, %s53_s7, [#allocation4], %s54_s8, 0  }
   0x3   :  { %50 = dma.done.wait [#allocation2], 2048 }
   0x4   :  { %51 = vsyncadd [#allocation2], 4294965248 }
   0x5   :  { %24 = vsyncmov [#allocation2] }
   0x8   :  { %s25_s13 = vpop.sfrf %24 }
   0x9   :  { %p44_p0 = scmp.ne.s32.totalorder %s25_s13, 0 }
   0xb   :  { %29 = shalt.err (%p44_p0)  }
   0xc   :  { %31 = vsyncmov [#allocation2 + $0x1] }
   0xf   :  { %s32_s14 = vpop.sfrf %31 }
  0x10   :  { %p45_p1 = scmp.ne.s32.totalorder %s32_s14, 0 }
  0x12   :  { %36 = shalt.err (%p45_p1)  }
  0x13   :  { %38 = vsyncmov [#allocation2 + $0x2] }
  0x16   :  { %s39_s15 = vpop.sfrf %38 }
  0x17   :  { %p46_p2 = scmp.ne.s32.totalorder %s39_s15, 0 }
  0x19   :  { %43 = shalt.err (%p46_p2)  }

</bundles_post_ra>
